<compile_context>
chip_gen: v7x
topology: tpu7x:2x2x1
jax: 0.10.0
libtpu: 0.0.40
codegen_flags: <defaults>
</compile_context>

<pallas_src>
import functools

import jax
import jax.numpy as jnp
from jax import lax
from jax.experimental import pallas as pl
from jax.experimental.pallas import tpu as pltpu


def _round_up(x, m):
    return (x + m - 1) // m * m


def _vmem_capacity_bytes():
    """Physical VMEM per core; conservative 64 MiB (v7x) fallback."""
    try:
        return int(pltpu.get_tpu_info().vmem_capacity_bytes)
    except Exception:
        return 64 * 1024 * 1024


def _pick_tile_n(n, c, itemsize, vmem_cap):
    """Budget-based spatial tile: ~vmem_cap/64 bytes per streamed block."""
    if n <= 128:
        return n                                   # single full-extent block
    target = max(1 << 20, min(4 << 20, vmem_cap // 64))
    t = target // max(c * itemsize, 1)
    t = max(512, min(8192, t))
    t = (t // 128) * 128
    t = min(t, (n // 128) * 128)                   # never exceed the extent
    return max(t, 128)


def _softmax_rowmin(energy):
    # softmax(rowmax(E) - E) == exp(rowmin(E) - E) / sum(...): a single row
    # reduction, all exp arguments <= 0 (stable), exact division.
    row_min = jnp.min(energy, axis=-1, keepdims=True)
    p = jnp.exp(row_min - energy)
    return p / jnp.sum(p, axis=-1, keepdims=True)


# ----------------------------------------------------------------------------
# Fused single-pass kernel: one grid step per batch, x read from HBM once.
# ----------------------------------------------------------------------------
def _fused_cam_kernel(gamma_ref, x_ref, o_ref):
    x = x_ref[0]                                             # (C, N), native dtype
    energy = lax.dot_general(x, x, (((1,), (1,)), ((), ())),
                             preferred_element_type=jnp.float32)   # (C, C) f32
    attn = (gamma_ref[0] * _softmax_rowmin(energy)).astype(x.dtype)
    out = jnp.dot(attn, x, preferred_element_type=jnp.float32)     # (C, N) f32
    o_ref[0] = (out + x.astype(jnp.float32)).astype(o_ref.dtype)


# ----------------------------------------------------------------------------
# Tiled fallback, pass 1: accumulate x @ x.T over spatial tiles, then softmax.
# ----------------------------------------------------------------------------
def _gram_softmax_kernel(x_ref, attn_ref, *, n_real):
    t = pl.program_id(1)

    @pl.when(t == 0)
    def _init():
        attn_ref[...] = jnp.zeros_like(attn_ref)

    xt = x_ref[0]                                            # (C, tile_n)
    tile_n = xt.shape[-1]
    if n_real % tile_n:                                      # static: ragged tail
        col = lax.broadcasted_iota(jnp.int32, xt.shape, 1)
        xt = jnp.where(col < (n_real - t * tile_n), xt, 0)
    attn_ref[0] += lax.dot_general(xt, xt, (((1,), (1,)), ((), ())),
                                   preferred_element_type=jnp.float32)

    @pl.when(t == pl.num_programs(1) - 1)
    def _finalize():
        attn_ref[0] = _softmax_rowmin(attn_ref[0])


# ----------------------------------------------------------------------------
# Tiled fallback, pass 2: out_tile = attn @ x_tile + x_tile (gamma pre-folded).
# ----------------------------------------------------------------------------
def _apply_kernel(attn_ref, x_ref, o_ref):
    xt = x_ref[0]                                            # (C, tile_n)
    out = jnp.dot(attn_ref[0], xt, preferred_element_type=jnp.float32)
    o_ref[0] = (out + xt.astype(jnp.float32)).astype(o_ref.dtype)


def cam_module_forward(x, gamma, *, tile_n=None, force_tiled=False):
    """x: (B, C, D, H, W); gamma: (1,) or scalar.  Matches CAM_Module.forward."""
    B, C, D, H, W = x.shape
    N = D * H * W
    x_flat = x.reshape(B, C, N)                              # metadata-only reshape
    gamma = jnp.asarray(gamma, jnp.float32).reshape((1,))

    itemsize = jnp.dtype(x.dtype).itemsize
    vmem_cap = _vmem_capacity_bytes()

    # ---- Fused single-pass path ---------------------------------------------
    # Per-step VMEM need: double-buffered (C, N) input + output blocks plus f32
    # temporaries for the attn @ x epilogue and the tiny (C, C) softmax.
    fused_need = (4 * itemsize + 12) * C * N + 4 * C * C * 4 + (1 << 20)
    if not force_tiled and fused_need <= int(0.7 * vmem_cap):
        vmem_limit = int(min(max(fused_need + (8 << 20), 32 << 20),
                             int(0.9 * vmem_cap)))
        out_flat = pl.pallas_call(
            _fused_cam_kernel,
            out_shape=jax.ShapeDtypeStruct((B, C, N), x.dtype),
            grid=(B,),
            in_specs=[
                pl.BlockSpec(memory_space=pltpu.MemorySpace.SMEM),   # gamma (1,)
                pl.BlockSpec((1, C, N), lambda b: (b, 0, 0)),        # whole batch
            ],
            out_specs=pl.BlockSpec((1, C, N), lambda b: (b, 0, 0)),
            compiler_params=pltpu.CompilerParams(
                dimension_semantics=("parallel",),
                vmem_limit_bytes=vmem_limit),
        )(gamma, x_flat)
        return out_flat.reshape(B, C, D, H, W)

    # ---- Two-pass tiled fallback for large spatial extents -------------------
    if tile_n is None:
        tile_n = _pick_tile_n(N, C, itemsize, vmem_cap)
    assert tile_n % 128 == 0 or tile_n == N, \
        "spatial tile must be a multiple of 128 lanes (or the full extent)"
    nt = pl.cdiv(N, tile_n)

    est = (4 * C * tile_n * itemsize + 2 * C * tile_n * 4
           + 6 * C * C * 4 + (1 << 20))
    vmem_limit = int(min(max(2 * est, 32 << 20), int(0.9 * vmem_cap)))

    # Pass 1: (B, C, C) channel attention (f32), spatial tiles as the reduction
    # axis; the gram accumulates directly in the resident output block.
    attn_f32 = pl.pallas_call(
        functools.partial(_gram_softmax_kernel, n_real=N),
        out_shape=jax.ShapeDtypeStruct((B, C, C), jnp.float32),
        grid=(B, nt),
        in_specs=[pl.BlockSpec((1, C, tile_n), lambda b, t: (b, 0, t))],
        out_specs=pl.BlockSpec((1, C, C), lambda b, t: (b, 0, 0)),
        compiler_params=pltpu.CompilerParams(
            dimension_semantics=("parallel", "arbitrary"),
            vmem_limit_bytes=vmem_limit),
    )(x_flat)

    # Fold gamma into the tiny attention matrix outside the kernels and store
    # it in the input dtype: pass 2 then has no per-tile scale or cast.
    attn = (gamma[0] * attn_f32).astype(x.dtype)

    # Pass 2: fully parallel streaming apply (both grid axes independent).
    out_flat = pl.pallas_call(
        _apply_kernel,
        out_shape=jax.ShapeDtypeStruct((B, C, N), x.dtype),
        grid=(B, nt),
        in_specs=[
            pl.BlockSpec((1, C, C), lambda b, t: (b, 0, 0)),
            pl.BlockSpec((1, C, tile_n), lambda b, t: (b, 0, t)),
        ],
        out_specs=pl.BlockSpec((1, C, tile_n), lambda b, t: (b, 0, t)),
        compiler_params=pltpu.CompilerParams(
            dimension_semantics=("parallel", "parallel"),
            vmem_limit_bytes=vmem_limit),
    )(attn, x_flat)

    return out_flat.reshape(B, C, D, H, W)


def cam_module_reference(x, gamma):
    """Pure-JAX reference mirroring the PyTorch forward (full f32 matmuls)."""
    B, C, D, H, W = x.shape
    xf = x.reshape(B, C, -1)
    energy = jnp.einsum('bcn,bkn->bck', xf, xf,
                        precision=jax.lax.Precision.HIGHEST)
    energy_new = jnp.max(energy, axis=-1, keepdims=True) - energy
    attention = jax.nn.softmax(energy_new, axis=-1)
    out = jnp.einsum('bck,bkn->bcn', attention, xf,
                     precision=jax.lax.Precision.HIGHEST).reshape(B, C, D, H, W)
    return gamma[0] * out + x


if __name__ == "__main__":
    key = jax.random.PRNGKey(0)

    # (B, C, D, H, W): B=2, C=4, N = 4*8*8 = 256.  Inputs are scaled down so
    # the exp() in the softmax does not amplify matmul-precision differences
    # between the kernel and the reference beyond the test tolerance.
    B, C, D, H, W = 2, 4, 4, 8, 8
    x = 0.05 * jax.random.normal(key, (B, C, D, H, W), dtype=jnp.float32)

    gamma0 = jnp.zeros((1,), dtype=jnp.float32)
    gamma1 = jnp.full((1,), 0.7, dtype=jnp.float32)

    # Case 1: module init (gamma = 0) -> output must reduce to the residual x.
    out0 = jax.block_until_ready(cam_module_forward(x, gamma0))
    assert out0.shape == (B, C, D, H, W)
    assert jnp.allclose(out0, cam_module_reference(x, gamma0), atol=1e-6, rtol=1e-6)

    # Case 2: non-zero gamma through the fused single-pass path.
    ref1 = cam_module_reference(x, gamma1)
    out1 = jax.block_until_ready(cam_module_forward(x, gamma1))
    assert jnp.allclose(out1, ref1, atol=2e-3, rtol=2e-3)

    # Case 3: forced two-pass tiled path: multi-tile spatial reduction with a
    # ragged tail (N = 140 -> 128 + masked 12), non-aligned C = 5, and B > 1.
    x2 = 0.05 * jax.random.normal(jax.random.PRNGKey(1), (2, 5, 4, 5, 7),
                                  dtype=jnp.float32)
    ref2 = cam_module_reference(x2, gamma1)
    out2 = jax.block_until_ready(
        cam_module_forward(x2, gamma1, force_tiled=True, tile_n=128))
    assert jnp.allclose(out2, ref2, atol=2e-3, rtol=2e-3)

    # Case 4: same ragged shape through the fused path (no padding anywhere).
    out3 = jax.block_until_ready(cam_module_forward(x2, gamma1))
    assert jnp.allclose(out3, ref2, atol=2e-3, rtol=2e-3)

    print("KERNEL_OK")
</pallas_src>

<mosaic_0001>
module attributes {stable_mosaic.version = 11 : i64} {
  func.func @_fused_cam_kernel(%arg0: i32, %arg1: memref<1xf32, #tpu.memory_space<smem>>, %arg2: memref<1x4x256xf32, #tpu.memory_space<vmem>>, %arg3: memref<1x4x256xf32, #tpu.memory_space<vmem>>) attributes {dimension_semantics = [#tpu.dimension_semantics<parallel>], iteration_bounds = array<i64: 2>, scalar_prefetch = 0 : i64, scratch_operands = 0 : i64, tpu.core_type = #tpu.core_type<tc>, window_params = [{transform_indices = @transform_0, window_bounds = array<i64: 1>}, {transform_indices = @transform_1, window_bounds = array<i64: 1, 4, 256>}, {transform_indices = @transform_2, window_bounds = array<i64: 1, 4, 256>}]} {
    %c0 = arith.constant 0 : index
    %c0_0 = arith.constant 0 : index
    %c0_1 = arith.constant 0 : index
    %0 = vector.load %arg2[%c0, %c0_0, %c0_1] : memref<1x4x256xf32, #tpu.memory_space<vmem>>, vector<1x4x256xf32>
    %1 = vector.shape_cast %0 : vector<1x4x256xf32> to vector<4x256xf32>
    %cst = arith.constant dense<0.000000e+00> : vector<4x4xf32>
    %2 = tpu.matmul %1, %1, %cst {dimension_numbers = #tpu.dot_dimension_numbers<[1], [1], [0], [0], [0, 0, 1, 0], [], []>} : vector<4x256xf32>, vector<4x256xf32>, vector<4x4xf32> -> vector<4x4xf32>
    %c0_2 = arith.constant 0 : index
    %3 = memref.load %arg1[%c0_2] : memref<1xf32, #tpu.memory_space<smem>>
    %cst_3 = arith.constant dense<0x7F800000> : vector<4xf32>
    %4 = vector.multi_reduction <minimumf>, %2, %cst_3 [1] : vector<4x4xf32> to vector<4xf32>
    %5 = vector.shape_cast %4 : vector<4xf32> to vector<4x1xf32>
    %6 = vector.broadcast %5 : vector<4x1xf32> to vector<4x4xf32>
    %7 = arith.subf %6, %2 : vector<4x4xf32>
    %8 = math.exp %7 : vector<4x4xf32>
    %cst_4 = arith.constant dense<0.000000e+00> : vector<4xf32>
    %9 = vector.multi_reduction <add>, %8, %cst_4 [1] : vector<4x4xf32> to vector<4xf32>
    %10 = vector.shape_cast %9 : vector<4xf32> to vector<4x1xf32>
    %11 = vector.broadcast %10 : vector<4x1xf32> to vector<4x4xf32>
    %12 = arith.divf %8, %11 : vector<4x4xf32>
    %13 = vector.broadcast %3 : f32 to vector<4x4xf32>
    %14 = arith.mulf %13, %12 : vector<4x4xf32>
    %cst_5 = arith.constant dense<0.000000e+00> : vector<4x256xf32>
    %15 = tpu.matmul %14, %1, %cst_5 {dimension_numbers = #tpu.dot_dimension_numbers<[1], [0], [0], [1], [0, 0, 1, 1], [], []>} : vector<4x4xf32>, vector<4x256xf32>, vector<4x256xf32> -> vector<4x256xf32>
    %16 = arith.addf %15, %1 : vector<4x256xf32>
    %c0_6 = arith.constant 0 : index
    %c0_7 = arith.constant 0 : index
    %c0_8 = arith.constant 0 : index
    %17 = vector.load %arg3[%c0_6, %c0_7, %c0_8] : memref<1x4x256xf32, #tpu.memory_space<vmem>>, vector<1x4x256xf32>
    %18 = vector.shape_cast %17 : vector<1x4x256xf32> to vector<4x256xf32>
    %19 = vector.shape_cast %16 : vector<4x256xf32> to vector<1x4x256xf32>
    tpu.vector_store %arg3[%c0_6, %c0_7, %c0_8], %19 {strides = array<i32>} : memref<1x4x256xf32, #tpu.memory_space<vmem>>, vector<1x4x256xf32>,
    return
  }
  func.func @transform_0(%arg0: i32) -> i32 {
    %c0_i32 = arith.constant 0 : i32
    %c0_i32_0 = arith.constant 0 : i32
    return %c0_i32 : i32
  }
  func.func @transform_1(%arg0: i32) -> (i32, i32, i32) {
    %c0_i32 = arith.constant 0 : i32
    %c0_i32_0 = arith.constant 0 : i32
    %c0_i32_1 = arith.constant 0 : i32
    return %arg0, %c0_i32, %c0_i32_0 : i32, i32, i32
  }
  func.func @transform_2(%arg0: i32) -> (i32, i32, i32) {
    %c0_i32 = arith.constant 0 : i32
    %c0_i32_0 = arith.constant 0 : i32
    %c0_i32_1 = arith.constant 0 : i32
    return %arg0, %c0_i32, %c0_i32_0 : i32, i32, i32
  }
}

</mosaic_0001>

<bundles_post_ra>
// kernel: tpu_custom_call.1
= control target key start
LH: loop header
LB: loop body
LE: loop exit
PB: predicated region body
PF: predicated region fallthrough
CT: control target
= control target key end

     0   :  { %s775_s0 = inlined_call_operand.<no memory space> [shape: f32[1], index: 0, kind: input, shape index: {}]   ;;  %s776_s1 = inlined_call_operand.hbm [shape: f32[2,4,256], index: 1, kind: input, shape index: {}]   ;;  %s777_s2 = inlined_call_operand.hbm [shape: f32[2,4,256], index: 2, kind: output, shape index: {}]  }
   0x1   :  { %7 = sst [smem:[#allocation2]] %s775_s0 }
   0x2   :  { %8 = vsyncpa [#allocation4], 0 }
   0x3   :  { %10 = vsyncpa [#allocation4 + $0x1], 0 }
   0x4   :  { %11 = vsyncpa [#allocation5], 0 }
   0x5   :  { %13 = vsyncpa [#allocation5 + $0x1], 0  ;;  %s610_s11 = smov 0   ;;  %s612_s12 = smov 0  }
   0x6   :  { %s614_s13 = smov 0   ;;  %s616_s14 = smov 0  }
   0x7 LB: > { %s631_s0 = sadd.s32 4294967295, %s587_s14   ;;  %s420_s15 = sadd.s32 4294967294, %s587_s14   ;;  %s587_s14 = sphi %s616_s14, %s792_s14   ;;  %s583_s13 = sphi %s614_s13, %s791_s13   ;;  %s579_s12 = sphi %s612_s12, %s790_s12   ;;  %s575_s11 = sphi %s610_s11, %s789_s11  }
   0x8   : > { %s635_s16 = sadd.s32 1, %s587_s14   ;;  %s47_s17 = sadd.s32 1, %s583_s13 }
   0x9   : > { %s44_s18 = ssub.s32 %s587_s14, %s635_s16  ;;  %p54_p0 = scmp.ne.s32.totalorder %s583_s13, %s579_s12 }
   0xa   : > { %p45_p1 = scmp.eq.s32.totalorder %s44_s18, 0  ;;  %p55_p2 = scmp.eq.s32.totalorder %s587_s14, 0 }
   0xb   : > { %p60_p3 = scmp.ne.s32.totalorder %s579_s12, %s575_s11  ;;  %p61_p4 = scmp.eq.s32.totalorder %s631_s0, 0 }
   0xc   : > { %s647_s19 = scalar_select %p45_p1, %s583_s13, %s47_s17  }
   0xd   : > { %p649_p5 = por %p55_p2, %p54_p0  ;;  %p653_p6 = por %p61_p4, %p60_p3 }
   0xe   : > { %p84_p7 = scmp.eq.s32.totalorder %s631_s0, 1  ;;  %p90_p8 = scmp.eq.s32.totalorder %s420_s15, 1 }
   0xf   : > { %p451_p10 = scmp.lt.s32.totalorder %s587_s14, 2  ;;  %s113_s24 = sand.u32 1, %s583_s13  }
  0x10   : > { %p660_p11 = por %p84_p7, %p54_p0  ;;  %p664_p12 = por %p90_p8, %p60_p3 }
  0x11   : > { %s437_s25 = sshll.u32 %s587_s14, 7  ;;  %s423_s26 = sshll.u32 %s113_s24, 3 }
  0x12   : > { %s781_s22 = scalar_select %p660_p11, 1, 0 }
  0x13   : > { %s782_s23 = scalar_select %p664_p12, 1, 0 }
  0x14   : > { %s673_s29 = scalar_lea.hbm %s776_s1, %s437_s25  ;;  %s117_s30 = scalar_lea.vmem [#allocation3], %s423_s26 }
  0x15   : > { %s125_s3 = sshll.u32 %s117_s30, 4  ;;  %p677_p13 = pnand %p451_p10, %p649_p5  ;;  %s681_s3 = int_to_ptr.vmem [resolvable:$true] %s125_s3 }
  0x16   : > { %s114_s5 = scalar_lea.sflag [#allocation4], %s113_s24  ;;  %s491_s6 = scalar_lea.hbm %s673_s29, 128 }
  0x17   : > { %p492_p2 = scmp.ne.s32.totalorder %s673_s29, %s491_s6  ;;  %p493_p3 = pneg %p677_p13 }
  0x18   : > { %s496_s9 = scalar_lea.hbm %s776_s1, 256  ;;  %p497_p5 = scmp.lt.u32.totalorder %s673_s29, %s776_s1 }
  0x19   : > { %p494_p4 = pnand %p493_p3, %p492_p2  ;;  %p498_p8 = scmp.lt.u32.totalorder %s496_s9, %s491_s6 }
  0x1a   : > { %p500_p9 = scmp.lt.u32.totalorder %s491_s6, %s673_s29 }
  0x1b   : > { %p495_p7 = pneg %p494_p4  ;;  %p499_p10 = por %p498_p8, %p497_p5 }
  0x1d   : > { %p501_p0 = por %p500_p9, %p499_p10 }
  0x1f   : > { %p502_p1 = pnand %p501_p0, %p495_p7 }
  0x21   : > { %505 = shalt.err (!%p502_p1)
}
  0x22   : > { %s506_s17 = scalar_lea.vmem %s681_s3, 128  ;;  %s589_s18 = smov [#allocation3]  }
  0x23   : > { %p507_p2 = scmp.ne.s32.totalorder %s681_s3, %s506_s17  ;;  %s511_s20 = sshll.u32 %s589_s18, 4  ;;  %s512_s20 = int_to_ptr.vmem [resolvable:$false] %s511_s20 }
  0x24   : > { %s513_s24 = scalar_lea.vmem %s512_s20, 256  ;;  %p514_p11 = scmp.lt.s32.totalorder %s681_s3, %s512_s20 }
  0x25   : > { %p509_p4 = pnand %p507_p2, %p493_p3  ;;  %p515_p5 = scmp.lt.s32.totalorder %s513_s24, %s506_s17 }
  0x27   : > { %p510_p12 = pneg %p509_p4  ;;  %p516_p8 = por %p515_p5, %p514_p11 }
  0x29   : > { %p517_p9 = pnand %p516_p8, %p510_p12 }
  0x2b   : > { %520 = shalt.err (!%p517_p9)
}
  0x2c   : > { %446 = dma.hbm_to_vmem [thread:$0]  (!%p677_p13), %s673_s29, 128, %s681_s3, %s114_s5  }
  0x2d   : > { %p784_p0 = scmp.lt.s32.totalorder %s587_s14, 3  ;;  %p785_p1 = scmp.ge.s32.totalorder %s587_s14, 1 }
  0x2f   : > { %p131_p3 = pnand %p785_p1, %p784_p0 }
  0x30   : > { %s715_s25 = sand.u32 (!%p131_p3), 1, %s579_s12  }
  0x31   : > { %134 = sbr.rel (%p131_p3) target bundleno = 823 (0x337), region = 28  ;;  %s427_s26 = sshll.u32 (!%p131_p3), %s715_s25, 3 }
  0x32   : > { %s137_s27 = scalar_lea.sflag (!%p131_p3), [#allocation4], %s715_s25  ;;  %s140_s28 = scalar_lea.vmem (!%p131_p3), [#allocation3], %s427_s26 }
  0x38   : > { %566 = dma.done.wait (%p653_p6), %s137_s27, 128  }
  0x39   : > { %568 = vsyncadd (%p653_p6), %s137_s27, 4294967168  ;;  %v161_v0 = vld [vmem:[%s140_s28] sm:$0xff]  ;;  %vm236_vm0 = vcmask 27648   ;;  %vm254_vm1 = vcmask 1043456   ;;  %v590_v10 = vmov 0.0   ;;  %s235_s21 = sld [smem:[#allocation2]] }
  0x3a   : > { %v163_v1 = vcombine.high %v161_v0, %v161_v0  ;;  %323 = vmatprep.mubr.f32.mxu1 %v590_v10  ;;  %vm250_vm2 = vcmask 31744   ;;  %s438_s29 = sshll.u32 %s631_s0, 7  ;;  %s160_s30 = scalar_lea.vmem [#allocation6], %s427_s26 }
  0x3b   : > { %s350_s3 = sshll.u32 %s160_s30, 4  ;;  %s731_s6 = scalar_lea.hbm %s777_s2, %s438_s29  ;;  %s733_s3 = int_to_ptr.vmem [resolvable:$true] %s350_s3 }
  0x3c   : > { %165 = vmatprep.subr.mxu0 %v163_v1  ;;  %229 = vmatprep.mubr.f32.mxu0 %v163_v1  ;;  %s336_s7 = scalar_lea.sflag [#allocation5], %s715_s25  ;;  %s521_s8 = scalar_lea.vmem %s733_s3, 128 }
  0x3d   : > { %166 = vmatpush1.xpose.msra.mxu0 %v161_v0  ;;  %429 = vmatprep.subr.msk.mxu1 %vm254_vm1, %v163_v1  ;;  %p522_p6 = scmp.ne.s32.totalorder %s733_s3, %s521_s8  ;;  %p786_p11 = scmp.ne.s32.totalorder %s781_s22, 0 }
  0x3e   : > { %430 = vmatpush1.msk.msra.mxu1 %vm254_vm1, %v161_v0  ;;  %s591_s0 = smov [#allocation6]  }
  0x3f   : > { %v248_v13 = vstv %s235_s21  ;;  %p523_p12 = pnand %p522_p6, %p786_p11  ;;  %s525_s9 = sshll.u32 %s591_s0, 4  ;;  %s526_s9 = int_to_ptr.vmem [resolvable:$false] %s525_s9 }
  0x40   : > { %230 = vmatmul.mubr.f32.vlgmr.msra.gmra.mrb[0].mxu0 %v161_v0  ;;  %s527_s10 = scalar_lea.vmem %s526_s9, 256  ;;  %p528_p7 = scmp.lt.s32.totalorder %s733_s3, %s526_s9 }
  0x41   : > { %p524_p13 = pneg %p523_p12  ;;  %p529_p10 = scmp.lt.s32.totalorder %s527_s10, %s521_s8 }
  0x43   : > { %p530_p2 = por %p529_p10, %p528_p7 }
  0x45   : > { %p531_p4 = pnand %p530_p2, %p524_p13 }
 0x113   : > { %v231_v2 = vpop.f32.mrb[0].mxu0 }
 0x114   : > { %v233_v3 = vpop.f32.mrb[1].mxu0  ;;  %v237_v4 = vsel %vm236_vm0, %v231_v2, inf }
 0x115   : > { %238 = vmin.xlane.f32.xlu0 %v237_v4 }
 0x1a2   : > { %v239_v5 = vpop.xlane.xlu0 %238 }
 0x1a3   : > { %v240_v6 = vsub.f32 %v239_v5, %v231_v2 }
 0x1a5   : > { %v241_v7 = vmul.f32 1.442695, %v240_v6 }
 0x1a7   : > { %487 = vpow2.f32 %v241_v7 }
 0x1b1   : > { %v488_v8 = vpop.eup %487 }
 0x1b2   : > { %v243_v9 = vsel %vm236_vm0, %v488_v8, 0.0 }
 0x1b3   : > { %244 = vadd.xlane.f32.xlu0 %v243_v9 }
 0x240   : > { %v245_v11 = vpop.xlane.xlu0 %244 }
 0x241   : > { %489 = vrcp.f32 %v245_v11 }
 0x24b   : > { %v490_v12 = vpop.eup %489 }
 0x24c   : > { %v247_v14 = vmul.f32 %v490_v12, %v488_v8 }
 0x24e   : > { %v249_v15 = vmul.f32 %v248_v13, %v247_v14 }
 0x250   : > { %431 = vmatmul.mubr.msk.f32.vlgmr.msra.gmra.mrb[0].mxu1 %vm250_vm2, %v249_v15 }
 0x323   : > { %v325_v16 = vpop.f32.mrb[0].mxu1 }
 0x324   : > { %v326_v17 = vadd.f32 %v325_v16, %v161_v0  ;;  %v327_v18 = vpop.f32.mrb[1].mxu1 }
 0x325   : > { %v328_v19 = vadd.f32 %v327_v18, %v163_v1 }
 0x327   : > { %v332_v20 = vcombine.low %v326_v17, %v328_v19 }
 0x329   : > { %334 = vst [vmem:[%s160_s30] sm:$0xff] %v332_v20 }
 0x32a   : > { %534 = shalt.err (!%p531_p4)
}
 0x32b   : > { %s535_s15 = scalar_lea.hbm %s731_s6, 128  ;;  %s539_s20 = scalar_lea.hbm %s777_s2, 256 }
 0x32c   : > { %p536_p5 = scmp.ne.s32.totalorder %s731_s6, %s535_s15  ;;  %p540_p0 = scmp.lt.u32.totalorder %s731_s6, %s777_s2 }
 0x32d   : > { %p541_p1 = scmp.lt.u32.totalorder %s539_s20, %s535_s15  ;;  %p543_p6 = scmp.lt.u32.totalorder %s535_s15, %s731_s6 }
 0x32e   : > { %p537_p8 = pnand %p536_p5, %p786_p11 }
 0x32f   : > { %p542_p3 = por %p541_p1, %p540_p0 }
 0x330   : > { %p538_p9 = pneg %p537_p8 }
 0x331   : > { %p544_p12 = por %p543_p6, %p542_p3 }
 0x333   : > { %p545_p13 = pnand %p544_p12, %p538_p9 }
 0x335   : > { %548 = shalt.err (!%p545_p13)
}
 0x336   : > { %441 = dma.vmem_to_hbm [thread:$0]  (%p786_p11), %s733_s3, 128, %s731_s6, %s336_s7  }
 0x337 PF: > { %s362_s26 = sand.u32 1, %s575_s11   ;;  %p787_p7 = scmp.ne.s32.totalorder %s782_s23, 0 }
 0x338   : > { %p788_p10 = scmp.ge.s32.totalorder %s587_s14, 2  ;;  %s363_s27 = scalar_lea.sflag [#allocation5], %s362_s26 }
 0x33a   : > { %p448_p2 = pnand %p788_p10, %p787_p7 }
 0x33c   : > { %570 = dma.done.wait (!%p448_p2), %s363_s27, 128  }
 0x33d   : > { %572 = vsyncadd (!%p448_p2), %s363_s27, 4294967168  ;;  %p16_p4 = scmp.ge.s32.totalorder %s635_s16, 4   ;;  %s789_s11 = smov %s579_s12 }
 0x33e   : > { %s790_s12 = smov %s583_s13  ;;  %s791_s13 = smov %s647_s19 }
 0x33f   : > { %s792_s14 = smov %s635_s16  ;;  %18 = sbr.rel (!%p16_p4) target bundleno = 7 (0x7), region = 73 }
 0x346   :  { %368 = vsyncpa [#allocation4], 1 }
 0x347   :  { %370 = vsyncpa [#allocation4 + $0x1], 1 }
 0x348   :  { %371 = vsyncpa [#allocation5], 1 }
 0x349   :  { %373 = vsyncpa [#allocation5 + $0x1], 1 }

</bundles_post_ra>
